<compile_context>
chip_gen: v6e
topology: v6e:2x2x1
jax: 0.10.0
libtpu: 0.0.40
codegen_flags: <defaults>
</compile_context>

<pallas_src>
import math

import numpy as np
import jax
import jax.numpy as jnp
from jax.experimental import pallas as pl
from jax.experimental.pallas import tpu as pltpu


# ----------------------------------------------------------------------------
# Kernels
# ----------------------------------------------------------------------------
def _shuffle_matmul_kernel(x_ref, pmat_ref, y_ref):
    # y = x @ P with P one-hot  =>  y[:, j] = x[:, perm[j]]
    # Exact: each output column multiplies exactly one element by 1.0.
    y_ref[...] = jnp.dot(
        x_ref[...], pmat_ref[...], preferred_element_type=jnp.float32
    ).astype(y_ref.dtype)


def _make_shuffle_gather_kernel(perm):
    # 1-D constant indices: no (tb, N) index tile is materialized per grid
    # step (vs. the old broadcast_to + take_along_axis).
    perm_const = jnp.asarray(np.asarray(perm), dtype=jnp.int32)

    def kernel(x_ref, y_ref):
        # TODO(synk): validate this lane-axis gather's lowering with
        # pl.lower_as_mlir for N >> 128; if it degrades into O((N/128)^2)
        # select/permute chains, prefer the one-hot matmul (or plain XLA
        # x[:, perm]) for those sizes instead.
        y_ref[...] = jnp.take(x_ref[...], perm_const, axis=-1)

    return kernel


# ----------------------------------------------------------------------------
# Sizing helpers
# ----------------------------------------------------------------------------
def _tpu_vmem_capacity_bytes():
    """Physical VMEM of the local TensorCore; conservative fallback (v7x)."""
    try:
        return int(pltpu.get_tpu_info().vmem_capacity_bytes)
    except Exception:
        return 64 << 20


def _pick_tile_b(rows, lane_width, itemsize, tile_budget_bytes):
    """Batch-row tile: (2 in + 2 out) double-buffered (tb, lane_width) tiles
    fill ~tile_budget_bytes; tb is a multiple of 8 (sublane).  Keep >= 2 grid
    steps when the batch allows so the 'parallel' axis shards across both v7x
    TensorCores and the software pipeline has overlap."""
    row_bytes = max(1, lane_width * itemsize)
    tb = (tile_budget_bytes // 4) // row_bytes
    tb = max(8, (tb // 8) * 8)
    if rows > 16:
        tb = min(tb, max(8, (rows // 2) // 8 * 8))
    return min(tb, rows)


def _sanitize_tile(tb, rows):
    tb = max(1, min(int(tb), rows))
    if tb < rows:
        tb = min(rows, max(8, (tb // 8) * 8))
    return tb


# ----------------------------------------------------------------------------
# Module wrapper
# ----------------------------------------------------------------------------
class ShufflePallas:
    """JAX/Pallas port of nbi.nn.flows.Shuffle (forward pass)."""

    def __init__(self, num_inputs, seed=0):
        np.random.seed(seed)
        self.perm = np.arange(0, num_inputs)
        np.random.shuffle(self.perm)
        self.inv_perm = np.argsort(self.perm)
        self.num_inputs = num_inputs

        n = num_inputs
        # P[i, j] = 1 iff i == perm[j]  =>  (x @ P)[:, j] = x[:, perm[j]]
        p_direct = np.zeros((n, n), dtype=np.float32)
        p_direct[self.perm, np.arange(n)] = 1.0
        p_inverse = np.zeros((n, n), dtype=np.float32)
        p_inverse[self.inv_perm, np.arange(n)] = 1.0
        self._p_base = {"direct": p_direct, "inverse": p_inverse}
        self._pmat_cache = {}
        # TODO(synk): highest-value optimization is module-level — fold this
        # static permutation into the adjacent layer's weights at init so no
        # standalone 2*B*N-byte HBM round trip is launched at all.

    # -- one-hot (optionally block-diagonal) permutation matrix, cached -------
    def _pmat(self, mode, group, dtype):
        key = (mode, int(group), jnp.dtype(dtype).name)
        if key not in self._pmat_cache:
            p = self._p_base[mode]
            if group > 1:
                p = np.kron(np.eye(group, dtype=np.float32), p)
            # cast is exact: P is one-hot
            self._pmat_cache[key] = jnp.asarray(p).astype(dtype)
        return self._pmat_cache[key]

    def __call__(self, inputs, cond_inputs=None, mode="direct", tile_b=None):
        assert mode in ("direct", "inverse")
        orig_shape = inputs.shape
        n = orig_shape[-1]
        assert n == self.num_inputs
        dtype = inputs.dtype
        itemsize = jnp.dtype(dtype).itemsize
        is_float = bool(jnp.issubdtype(dtype, jnp.floating))
        perm = self.perm if mode == "direct" else self.inv_perm

        # collapse leading dims -> (B, N); permutation acts on the last axis
        x2 = inputs.reshape(-1, n)
        b = x2.shape[0]

        # dtype-aware MXU-vs-gather crossover (conservative across v5e/v6e/
        # v7x: the one-hot matmul stays HBM-bound below roughly these N).
        # Non-float dtypes always gather (v7x MXU has no int path; the matmul
        # accumulates in f32).
        gather_threshold = {1: 1024, 2: 512}.get(itemsize, 256)
        use_matmul = is_float and n <= gather_threshold

        vmem_phys = _tpu_vmem_capacity_bytes()
        tile_budget = min(vmem_phys // 2, 32 << 20)

        if use_matmul:
            # ---- MXU path: one-hot matmul, P resident in VMEM ---------------
            # Lane-dense packing: fold G batch rows into the lane axis when
            # N < 128 so loads/stores are full 128-lane vst and the MXU sees a
            # contraction dim >= 128.  Row-major reshape is free.
            group = 1
            if n < 128 and 128 % n == 0:
                group = math.gcd(b, 128 // n)
            lanes = group * n
            bp = b // group
            xk = x2.reshape(bp, lanes) if group > 1 else x2

            tb = (_pick_tile_b(bp, lanes, itemsize, tile_budget)
                  if tile_b is None else _sanitize_tile(tile_b, bp))
            grid = (pl.cdiv(bp, tb),)
            pmat = self._pmat(mode, group, dtype)

            # P's index_map is constant -> stays resident; drop its dead
            # second pipeline buffer when P is big enough to matter.
            p_spec = pl.BlockSpec((lanes, lanes), lambda i: (0, 0))
            if lanes >= 512:
                try:
                    p_spec = pl.BlockSpec((lanes, lanes), lambda i: (0, 0),
                                          pipeline_mode=pl.Buffered(1))
                except (TypeError, AttributeError):
                    pass

            planned = 4 * tb * lanes * itemsize + 2 * lanes * lanes * itemsize
            vmem_limit = int(min(vmem_phys * 3 // 4,
                                 max(16 << 20, planned + (8 << 20))))
            cparams = pltpu.CompilerParams(
                dimension_semantics=("parallel",),
                vmem_limit_bytes=vmem_limit,
            )

            yk = pl.pallas_call(
                _shuffle_matmul_kernel,
                out_shape=jax.ShapeDtypeStruct((bp, lanes), dtype),
                grid=grid,
                in_specs=[pl.BlockSpec((tb, lanes), lambda i: (i, 0)), p_spec],
                out_specs=pl.BlockSpec((tb, lanes), lambda i: (i, 0)),
                compiler_params=cparams,
                cost_estimate=pl.CostEstimate(
                    flops=2 * bp * lanes * lanes,
                    transcendentals=0,
                    bytes_accessed=(2 * bp * lanes + lanes * lanes) * itemsize,
                ),
            )(xk, pmat)
            y2 = yk.reshape(b, n) if group > 1 else yk
        else:
            # ---- lane-gather path: O(B*N) movement, no N^2 matrix -----------
            tb = (_pick_tile_b(b, n, itemsize, tile_budget)
                  if tile_b is None else _sanitize_tile(tile_b, b))
            grid = (pl.cdiv(b, tb),)
            planned = 4 * tb * n * itemsize
            vmem_limit = int(min(vmem_phys * 3 // 4,
                                 max(16 << 20, planned + (8 << 20))))
            cparams = pltpu.CompilerParams(
                dimension_semantics=("parallel",),
                vmem_limit_bytes=vmem_limit,
            )
            y2 = pl.pallas_call(
                _make_shuffle_gather_kernel(perm),
                out_shape=jax.ShapeDtypeStruct((b, n), dtype),
                grid=grid,
                in_specs=[pl.BlockSpec((tb, n), lambda i: (i, 0))],
                out_specs=pl.BlockSpec((tb, n), lambda i: (i, 0)),
                compiler_params=cparams,
                cost_estimate=pl.CostEstimate(
                    flops=0,
                    transcendentals=0,
                    bytes_accessed=2 * b * n * itemsize,
                ),
            )(x2)

        y = y2.reshape(orig_shape)
        # log|det J| of a permutation is identically zero -> compile-time
        # constant in the wrapper; no masked (B, 1) store stream in-kernel.
        logdet = jnp.zeros(orig_shape[:-1] + (1,), jnp.float32)
        return y, logdet


# ----------------------------------------------------------------------------
# Self-test
# ----------------------------------------------------------------------------
if __name__ == "__main__":
    key = jax.random.PRNGKey(0)

    # --- main path: N=16 f32 -> lane-dense packed MXU path (G=8, lanes=128)
    B, N = 8, 16
    x = jax.random.normal(key, (B, N), dtype=jnp.float32)
    flow = ShufflePallas(num_inputs=N, seed=0)

    y, logdet = flow(x, mode="direct")
    jax.block_until_ready((y, logdet))
    y_ref = x[:, flow.perm]
    assert y.shape == (B, N) and logdet.shape == (B, 1)
    assert jnp.allclose(y, y_ref, atol=1e-6)
    assert jnp.allclose(logdet, 0.0)

    # inverse round-trips
    x_back, logdet_inv = flow(y, mode="inverse")
    jax.block_until_ready((x_back, logdet_inv))
    assert jnp.allclose(x_back, x, atol=1e-6)
    assert jnp.allclose(logdet_inv, 0.0)

    # --- batch-tiled multi-step grid ("parallel" axis, pipelined):
    #     packed rows bp=32, tile 8 -> grid=(4,), blocks exactly (8, 128)
    B2 = 256
    x2 = jax.random.normal(jax.random.PRNGKey(1), (B2, N), dtype=jnp.float32)
    y2, ld2 = flow(x2, mode="direct", tile_b=8)
    jax.block_until_ready((y2, ld2))
    assert jnp.allclose(y2, x2[:, flow.perm], atol=1e-6)
    assert jnp.allclose(ld2, 0.0)

    # --- N that does not divide 128 -> unpacked matmul path (full-dim block)
    B3, N3 = 16, 24
    flow3 = ShufflePallas(num_inputs=N3, seed=1)
    x3 = jax.random.normal(jax.random.PRNGKey(2), (B3, N3), dtype=jnp.float32)
    y3, ld3 = flow3(x3, mode="direct")
    jax.block_until_ready((y3, ld3))
    assert jnp.allclose(y3, x3[:, flow3.perm], atol=1e-6)
    assert jnp.allclose(ld3, 0.0)

    print("KERNEL_OK")
</pallas_src>

<mosaic_0001>
module attributes {stable_mosaic.version = 11 : i64} {
  func.func @_shuffle_matmul_kernel(%arg0: i32, %arg1: memref<1x128xf32, #tpu.memory_space<vmem>>, %arg2: memref<128x128xf32, #tpu.memory_space<vmem>>, %arg3: memref<1x128xf32, #tpu.memory_space<vmem>>) attributes {dimension_semantics = [#tpu.dimension_semantics<parallel>], iteration_bounds = array<i64: 1>, scalar_prefetch = 0 : i64, scratch_operands = 0 : i64, tpu.core_type = #tpu.core_type<tc>, window_params = [{transform_indices = @transform_0, window_bounds = array<i64: 1, 128>}, {pipeline_mode = #tpu.pipeline_mode<synchronous>, transform_indices = @transform_1, window_bounds = array<i64: 128, 128>}, {transform_indices = @transform_2, window_bounds = array<i64: 1, 128>}]} {
    %c0 = arith.constant 0 : index
    %c0_0 = arith.constant 0 : index
    %0 = vector.load %arg1[%c0, %c0_0] : memref<1x128xf32, #tpu.memory_space<vmem>>, vector<1x128xf32>
    %c0_1 = arith.constant 0 : index
    %c0_2 = arith.constant 0 : index
    %1 = vector.load %arg2[%c0_1, %c0_2] : memref<128x128xf32, #tpu.memory_space<vmem>>, vector<128x128xf32>
    %cst = arith.constant dense<0.000000e+00> : vector<1x128xf32>
    %2 = tpu.matmul %0, %1, %cst {dimension_numbers = #tpu.dot_dimension_numbers<[1], [0], [0], [1], [0, 0, 1, 1], [], []>} : vector<1x128xf32>, vector<128x128xf32>, vector<1x128xf32> -> vector<1x128xf32>
    %c0_3 = arith.constant 0 : index
    %c0_4 = arith.constant 0 : index
    %3 = vector.load %arg3[%c0_3, %c0_4] : memref<1x128xf32, #tpu.memory_space<vmem>>, vector<1x128xf32>
    tpu.vector_store %arg3[%c0_3, %c0_4], %2 {strides = array<i32>} : memref<1x128xf32, #tpu.memory_space<vmem>>, vector<1x128xf32>,
    return
  }
  func.func @transform_0(%arg0: i32) -> (i32, i32) {
    %c0_i32 = arith.constant 0 : i32
    %c0_i32_0 = arith.constant 0 : i32
    return %arg0, %c0_i32 : i32, i32
  }
  func.func @transform_1(%arg0: i32) -> (i32, i32) {
    %c0_i32 = arith.constant 0 : i32
    %c0_i32_0 = arith.constant 0 : i32
    %c0_i32_1 = arith.constant 0 : i32
    return %c0_i32, %c0_i32_0 : i32, i32
  }
  func.func @transform_2(%arg0: i32) -> (i32, i32) {
    %c0_i32 = arith.constant 0 : i32
    %c0_i32_0 = arith.constant 0 : i32
    return %arg0, %c0_i32 : i32, i32
  }
}

</mosaic_0001>

<bundles_post_ra>
// kernel: tpu_custom_call.1
= control target key start
LH: loop header
LB: loop body
LE: loop exit
PB: predicated region body
PF: predicated region fallthrough
CT: control target
= control target key end

     0   :  { %7 = vsyncpa [#allocation3], 0  ;;  %s298_s0 = inlined_call_operand.hbm [shape: f32[1,128], index: 0, kind: input, shape index: {}]   ;;  %s299_s1 = inlined_call_operand.hbm [shape: f32[128,128], index: 1, kind: input, shape index: {}]   ;;  %s300_s2 = inlined_call_operand.hbm [shape: f32[1,128], index: 2, kind: output, shape index: {}]  }
   0x1   :  { %8 = vsyncpa [#allocation6], 0 }
   0x2   :  { %9 = vsyncpa [#allocation4], 0  ;;  %s267_s9 = smov [#allocation2]   ;;  %s268_s11 = smov [#allocation5]  }
   0x3   :  { %s16_s10 = sshll.u32 %s267_s9, 4  ;;  %s25_s12 = sshll.u32 %s268_s11, 4  ;;  %s17_s10 = int_to_ptr.vmem [resolvable:$true] %s16_s10  ;;  %s26_s12 = int_to_ptr.vmem [resolvable:$true] %s25_s12 }
   0x4   :  { %s209_s13 = scalar_lea.vmem %s17_s10, 16  ;;  %s213_s14 = scalar_lea.vmem %s17_s10, 32 }
   0x5   :  { %p210_p0 = scmp.ne.s32.totalorder %s17_s10, %s209_s13  ;;  %p214_p1 = scmp.lt.s32.totalorder %s17_s10, %s17_s10 }
   0x6   :  { %p215_p2 = scmp.lt.s32.totalorder %s213_s14, %s209_s13 }
   0x8   :  { %p216_p3 = por %p215_p2, %p214_p1 }
   0xa   :  { %p217_p4 = pnand %p216_p3, %p210_p0 }
   0xc   :  { %220 = shalt.err (!%p217_p4)
}
   0xd   :  { %19 = dma.hbm_to_vmem [thread:$0]  %s298_s0, 16, %s17_s10, [#allocation3]  }
   0xe   :  { %s229_s17 = scalar_lea.vmem %s26_s12, 2048  ;;  %p234_p6 = scmp.lt.s32.totalorder %s26_s12, %s26_s12 }
   0xf   :  { %p230_p5 = scmp.ne.s32.totalorder %s26_s12, %s229_s17  ;;  %p235_p7 = scmp.lt.s32.totalorder %s229_s17, %s229_s17 }
  0x11   :  { %p236_p8 = por %p235_p7, %p234_p6 }
  0x13   :  { %p237_p9 = pnand %p236_p8, %p230_p5 }
  0x15   :  { %240 = shalt.err (!%p237_p9)
}
  0x16   :  { %s269_s18 = smov 128   ;;  %s270_s19 = smov 8  }
  0x17   :  { %31 = dma.hbm_to_vmem [thread:$0]  %s299_s1, 2048, %s26_s12, [#allocation6], %s269_s18, %s269_s18, %s270_s19  }
  0x18   :  { %261 = dma.done.wait [#allocation3], 16  }
  0x19   :  { %262 = vsyncadd [#allocation3], 4294967280 }
  0x1a   :  { %263 = dma.done.wait [#allocation6], 2048  }
  0x1b   :  { %264 = vsyncadd [#allocation6], 4294965248  ;;  %v271_v0 = vmov 0.0   ;;  %vm272_vm0 = vmmov 0   ;;  %v54_v1 = vld [vmem:[#allocation5 + $0x78] sm:$0xff]  ;;  %v53_v2 = vld [vmem:[#allocation5 + $0x70] sm:$0xff] }
  0x1c   :  { %159 = vmatprep.subr.mxu0 %v271_v0  ;;  %191 = vmatprep.mubr.msk.f32.mxu0 %vm272_vm0, %v271_v0  ;;  %v52_v3 = vld [vmem:[#allocation5 + $0x68] sm:$0xff]  ;;  %v51_v4 = vld [vmem:[#allocation5 + $0x60] sm:$0xff]  ;;  %v50_v5 = vld [vmem:[#allocation5 + $0x58] sm:$0xff]  ;;  %s273_s0 = smov [#allocation7]  }
  0x1d   :  { %160 = vmatpush3.msra.mxu0 %v54_v1  ;;  %v49_v6 = vld [vmem:[#allocation5 + $0x50] sm:$0xff]  ;;  %v48_v7 = vld [vmem:[#allocation5 + $0x48] sm:$0xff]  ;;  %v47_v8 = vld [vmem:[#allocation5 + $0x40] sm:$0xff]  ;;  %s132_s1 = sshll.u32 %s273_s0, 4  ;;  %s133_s1 = int_to_ptr.vmem [resolvable:$true] %s132_s1 }
  0x1e   :  { %161 = vmatprep.subr.mxu0 %v271_v0  ;;  %v46_v9 = vld [vmem:[#allocation5 + $0x38] sm:$0xff]  ;;  %v45_v10 = vld [vmem:[#allocation5 + $0x30] sm:$0xff]  ;;  %v44_v11 = vld [vmem:[#allocation5 + $0x28] sm:$0xff]  ;;  %s241_s22 = scalar_lea.vmem %s133_s1, 16  ;;  %s245_s23 = scalar_lea.vmem %s133_s1, 32 }
  0x1f   :  { %162 = vmatpush3.msra.mxu0 %v53_v2  ;;  %v43_v12 = vld [vmem:[#allocation5 + $0x20] sm:$0xff]  ;;  %v42_v13 = vld [vmem:[#allocation5 + $0x18] sm:$0xff]  ;;  %v41_v14 = vld [vmem:[#allocation5 + $0x10] sm:$0xff]  ;;  %p242_p10 = scmp.ne.s32.totalorder %s133_s1, %s241_s22  ;;  %p246_p11 = scmp.lt.s32.totalorder %s133_s1, %s133_s1 }
  0x20   :  { %163 = vmatprep.subr.mxu0 %v271_v0  ;;  %v40_v15 = vld [vmem:[#allocation5 + $0x8] sm:$0xff]  ;;  %v39_v16 = vld [vmem:[#allocation5] sm:$0xff]  ;;  %v38_v17 = vld [vmem:[#allocation2] sm:$0x1]  ;;  %p247_p12 = scmp.lt.s32.totalorder %s245_s23, %s241_s22 }
  0x21   :  { %164 = vmatpush3.msra.mxu0 %v52_v3 }
  0x22   :  { %165 = vmatprep.subr.mxu0 %v271_v0  ;;  %p248_p13 = por %p247_p12, %p246_p11 }
  0x23   :  { %166 = vmatpush3.msra.mxu0 %v51_v4 }
  0x24   :  { %167 = vmatprep.subr.mxu0 %v271_v0  ;;  %p249_p0 = pnand %p248_p13, %p242_p10 }
  0x25   :  { %168 = vmatpush3.msra.mxu0 %v50_v5 }
  0x26   :  { %169 = vmatprep.subr.mxu0 %v271_v0 }
  0x27   :  { %170 = vmatpush3.msra.mxu0 %v49_v6 }
  0x28   :  { %171 = vmatprep.subr.mxu0 %v271_v0 }
  0x29   :  { %172 = vmatpush3.msra.mxu0 %v48_v7 }
  0x2a   :  { %173 = vmatprep.subr.mxu0 %v271_v0 }
  0x2b   :  { %174 = vmatpush3.msra.mxu0 %v47_v8 }
  0x2c   :  { %175 = vmatprep.subr.mxu0 %v271_v0 }
  0x2d   :  { %176 = vmatpush3.msra.mxu0 %v46_v9 }
  0x2e   :  { %177 = vmatprep.subr.mxu0 %v271_v0 }
  0x2f   :  { %178 = vmatpush3.msra.mxu0 %v45_v10 }
  0x30   :  { %179 = vmatprep.subr.mxu0 %v271_v0 }
  0x31   :  { %180 = vmatpush3.msra.mxu0 %v44_v11 }
  0x32   :  { %181 = vmatprep.subr.mxu0 %v271_v0 }
  0x33   :  { %182 = vmatpush3.msra.mxu0 %v43_v12 }
  0x34   :  { %183 = vmatprep.subr.mxu0 %v271_v0 }
  0x35   :  { %184 = vmatpush3.msra.mxu0 %v42_v13 }
  0x36   :  { %185 = vmatprep.subr.mxu0 %v271_v0 }
  0x37   :  { %186 = vmatpush3.msra.mxu0 %v41_v14 }
  0x38   :  { %187 = vmatprep.subr.mxu0 %v271_v0 }
  0x39   :  { %188 = vmatpush3.msra.mxu0 %v40_v15 }
  0x3a   :  { %189 = vmatprep.subr.mxu0 %v271_v0 }
  0x3b   :  { %190 = vmatpush3.msra.mxu0 %v39_v16 }
  0x3c   :  { %192 = vmatmul.mubr.f32.vlgmr.msra.gmra.mxu0 %v38_v17 }
  0xfc   :  { %v121_v18 = vpop.f32.mrf.mxu0 }
  0xfd   :  { %125 = vst [vmem:[#allocation7] sm:$0x1] %v121_v18 }
  0xfe   :  { %v193_v19 = vpop.f32.mrf.mxu0 }
  0xff   :  { %252 = shalt.err (!%p249_p0)
}
 0x100   :  { %135 = dma.vmem_to_hbm [thread:$0]  %s133_s1, 16, %s300_s2, [#allocation4]  }
 0x101   :  { %265 = dma.done.wait [#allocation4], 16  }
 0x102   :  { %266 = vsyncadd [#allocation4], 4294967280 }
 0x103   :  { %139 = vsyncpa [#allocation3], 1 }
 0x104   :  { %140 = vsyncpa [#allocation6], 1 }
 0x105   :  { %141 = vsyncpa [#allocation4], 1 }

</bundles_post_ra>
